<compile_context>
chip_gen: v6e
topology: v6e:2x2x1
jax: 0.10.0
libtpu: 0.0.40
codegen_flags: <defaults>
</compile_context>

<pallas_src>
import functools

import jax
import jax.numpy as jnp
from jax.experimental import pallas as pl
from jax.experimental.pallas import tpu as pltpu


def generator3_kernel(x_ref, w1_ref, b1_ref, w2_ref, b2_ref,
                      w3_ref, b3_ref, w4_ref, b4_ref, o_ref):
    """x_ref: [in, TB]; w_i: [out_i, in_i]; b_i: [out_i, 1]; o_ref: [out, TB]."""
    cdt = w1_ref.dtype  # compute/storage dtype of weights & activations fed to the MXU

    # Layer 1: tanh(W1 @ X + b1)   -> [h1, TB]
    h = jnp.tanh(jnp.dot(w1_ref[...], x_ref[...],
                         preferred_element_type=jnp.float32)
                 + b1_ref[...].astype(jnp.float32))
    # Layer 2: tanh(W2 @ h + b2)   -> [h2, TB]
    h = jnp.tanh(jnp.dot(w2_ref[...], h.astype(cdt),
                         preferred_element_type=jnp.float32)
                 + b2_ref[...].astype(jnp.float32))
    # Layer 3: tanh(W3 @ h + b3)   -> [h3, TB]
    h = jnp.tanh(jnp.dot(w3_ref[...], h.astype(cdt),
                         preferred_element_type=jnp.float32)
                 + b3_ref[...].astype(jnp.float32))
    # Layer 4: sigmoid(W4 @ h + b4) -> [out, TB], lane-dense store
    z = (jnp.dot(w4_ref[...], h.astype(cdt),
                 preferred_element_type=jnp.float32)
         + b4_ref[...].astype(jnp.float32))
    o_ref[...] = jax.nn.sigmoid(z)


@functools.partial(jax.jit, static_argnames=("tile_b", "compute_dtype"))
def generator3_forward(x, params, *, tile_b=128, compute_dtype=jnp.float32):
    """x: [B, input_size]; params: 4 x (W [out, in], b [out, 1]). Returns [B, output_size]."""
    (w1, b1), (w2, b2), (w3, b3), (w4, b4) = params
    B, in_dim = x.shape
    h1, h2, h3 = w1.shape[0], w2.shape[0], w3.shape[0]
    out_dim = w4.shape[0]

    # --- layout plumbing: batch on lanes, pad batch to a multiple of tile_b ---
    nb = pl.cdiv(B, tile_b)
    Bp = nb * tile_b
    xT = x.T                                   # [in_dim, B]
    if Bp != B:
        xT = jnp.pad(xT, ((0, 0), (0, Bp - B)))

    # Optional bf16 storage/matmul path (v6e/v7x): halves DMA bytes, f32 MXU accumulation.
    xT = xT.astype(compute_dtype)
    ws = [w.astype(compute_dtype) for w in (w1, w2, w3, w4)]
    bs = [b.astype(compute_dtype) for b in (b1, b2, b3, b4)]

    def batch_tile_spec(rows):
        # Block over the batch (lane) axis only; feature axis stays whole.
        return pl.BlockSpec((rows, tile_b), lambda i: (0, i))

    def resident_spec(shape):
        # Whole array, same block for every grid step -> stays resident in VMEM.
        nd = len(shape)
        return pl.BlockSpec(shape, lambda i, _nd=nd: (0,) * _nd)

    flops = 2 * Bp * (in_dim * h1 + h1 * h2 + h2 * h3 + h3 * out_dim)
    transcendentals = Bp * (h1 + h2 + h3 + out_dim)
    param_bytes = sum(int(a.size) * a.dtype.itemsize for a in (*ws, *bs))
    bytes_accessed = (int(xT.size) * xT.dtype.itemsize
                      + Bp * out_dim * 4
                      + param_bytes)

    out_t = pl.pallas_call(
        generator3_kernel,
        out_shape=jax.ShapeDtypeStruct((out_dim, Bp), jnp.float32),
        grid=(nb,),
        in_specs=[
            batch_tile_spec(in_dim),
            resident_spec(ws[0].shape), resident_spec(bs[0].shape),
            resident_spec(ws[1].shape), resident_spec(bs[1].shape),
            resident_spec(ws[2].shape), resident_spec(bs[2].shape),
            resident_spec(ws[3].shape), resident_spec(bs[3].shape),
        ],
        out_specs=batch_tile_spec(out_dim),
        compiler_params=pltpu.CompilerParams(
            dimension_semantics=("parallel",),   # batch tiles shard across v7x's 2 TCs
        ),
        cost_estimate=pl.CostEstimate(
            flops=flops,
            transcendentals=transcendentals,
            bytes_accessed=bytes_accessed,
        ),
    )(xT, ws[0], bs[0], ws[1], bs[1], ws[2], bs[2], ws[3], bs[3])

    return out_t[:, :B].T                       # back to [B, out_dim]


def init_linear(key, in_features, out_features):
    """PyTorch nn.Linear-style init: U(-1/sqrt(in), 1/sqrt(in)).
    Returns (W [out, in], b [out, 1]) — PyTorch-native weight layout."""
    kw, kb = jax.random.split(key)
    bound = 1.0 / jnp.sqrt(jnp.float32(in_features))
    w = jax.random.uniform(kw, (out_features, in_features), jnp.float32,
                           minval=-bound, maxval=bound)
    b = jax.random.uniform(kb, (out_features, 1), jnp.float32,
                           minval=-bound, maxval=bound)
    return w, b


def reference_forward(x, params):
    (w1, b1), (w2, b2), (w3, b3), (w4, b4) = params
    h = jnp.tanh(x @ w1.T + b1.T)
    h = jnp.tanh(h @ w2.T + b2.T)
    h = jnp.tanh(h @ w3.T + b3.T)
    return jax.nn.sigmoid(h @ w4.T + b4.T)


if __name__ == "__main__":
    # Generator3(16, 32, 64, 32, 16); batch chosen to exercise padding + a 2-step grid.
    batch = 200
    input_size, h1, h2, h3, output_size = 16, 32, 64, 32, 16

    key = jax.random.PRNGKey(0)
    kx, k1, k2, k3, k4 = jax.random.split(key, 5)

    x = jax.random.normal(kx, (batch, input_size), jnp.float32)
    params = (
        init_linear(k1, input_size, h1),
        init_linear(k2, h1, h2),
        init_linear(k3, h2, h3),
        init_linear(k4, h3, output_size),
    )

    ref = reference_forward(x, params)

    # f32 path (default; matches reference tightly — this is the v5e-safe path).
    out_f32 = generator3_forward(x, params, tile_b=128, compute_dtype=jnp.float32)
    out_f32 = jax.block_until_ready(out_f32)
    assert out_f32.shape == (batch, output_size)
    assert jnp.allclose(out_f32, ref, atol=1e-5, rtol=1e-5)

    # bf16 storage/matmul path (v6e/v7x): f32 MXU accumulation, f32 activations.
    out_bf16 = generator3_forward(x, params, tile_b=128, compute_dtype=jnp.bfloat16)
    out_bf16 = jax.block_until_ready(out_bf16)
    assert out_bf16.shape == (batch, output_size)
    assert jnp.allclose(out_bf16, ref, atol=3e-2, rtol=3e-2)

    print("KERNEL_OK")
</pallas_src>

<mosaic_0001>
module attributes {stable_mosaic.version = 11 : i64} {
  func.func @generator3_kernel(%arg0: i32, %arg1: memref<16x128xf32, #tpu.memory_space<vmem>>, %arg2: memref<32x16xf32, #tpu.memory_space<vmem>>, %arg3: memref<32x1xf32, #tpu.memory_space<vmem>>, %arg4: memref<64x32xf32, #tpu.memory_space<vmem>>, %arg5: memref<64x1xf32, #tpu.memory_space<vmem>>, %arg6: memref<32x64xf32, #tpu.memory_space<vmem>>, %arg7: memref<32x1xf32, #tpu.memory_space<vmem>>, %arg8: memref<16x32xf32, #tpu.memory_space<vmem>>, %arg9: memref<16x1xf32, #tpu.memory_space<vmem>>, %arg10: memref<16x128xf32, #tpu.memory_space<vmem>>) attributes {dimension_semantics = [#tpu.dimension_semantics<parallel>], iteration_bounds = array<i64: 2>, scalar_prefetch = 0 : i64, scratch_operands = 0 : i64, tpu.core_type = #tpu.core_type<tc>, window_params = [{transform_indices = @transform_0, window_bounds = array<i64: 16, 128>}, {pipeline_mode = #tpu.pipeline_mode<synchronous>, transform_indices = @transform_1, window_bounds = array<i64: 32, 16>}, {pipeline_mode = #tpu.pipeline_mode<synchronous>, transform_indices = @transform_2, window_bounds = array<i64: 32, 1>}, {pipeline_mode = #tpu.pipeline_mode<synchronous>, transform_indices = @transform_3, window_bounds = array<i64: 64, 32>}, {pipeline_mode = #tpu.pipeline_mode<synchronous>, transform_indices = @transform_4, window_bounds = array<i64: 64, 1>}, {pipeline_mode = #tpu.pipeline_mode<synchronous>, transform_indices = @transform_5, window_bounds = array<i64: 32, 64>}, {pipeline_mode = #tpu.pipeline_mode<synchronous>, transform_indices = @transform_6, window_bounds = array<i64: 32, 1>}, {pipeline_mode = #tpu.pipeline_mode<synchronous>, transform_indices = @transform_7, window_bounds = array<i64: 16, 32>}, {pipeline_mode = #tpu.pipeline_mode<synchronous>, transform_indices = @transform_8, window_bounds = array<i64: 16, 1>}, {transform_indices = @transform_9, window_bounds = array<i64: 16, 128>}]} {
    %c0 = arith.constant 0 : index
    %c0_0 = arith.constant 0 : index
    %0 = vector.load %arg2[%c0, %c0_0] : memref<32x16xf32, #tpu.memory_space<vmem>>, vector<32x16xf32>
    %c0_1 = arith.constant 0 : index
    %c0_2 = arith.constant 0 : index
    %1 = vector.load %arg1[%c0_1, %c0_2] : memref<16x128xf32, #tpu.memory_space<vmem>>, vector<16x128xf32>
    %cst = arith.constant dense<0.000000e+00> : vector<32x128xf32>
    %2 = tpu.matmul %0, %1, %cst {dimension_numbers = #tpu.dot_dimension_numbers<[1], [0], [0], [1], [0, 0, 1, 1], [], []>} : vector<32x16xf32>, vector<16x128xf32>, vector<32x128xf32> -> vector<32x128xf32>
    %c0_3 = arith.constant 0 : index
    %c0_4 = arith.constant 0 : index
    %3 = vector.load %arg3[%c0_3, %c0_4] : memref<32x1xf32, #tpu.memory_space<vmem>>, vector<32x1xf32>
    %4 = vector.broadcast %3 : vector<32x1xf32> to vector<32x128xf32>
    %5 = arith.addf %2, %4 : vector<32x128xf32>
    %6 = math.tanh %5 : vector<32x128xf32>
    %c0_5 = arith.constant 0 : index
    %c0_6 = arith.constant 0 : index
    %7 = vector.load %arg4[%c0_5, %c0_6] : memref<64x32xf32, #tpu.memory_space<vmem>>, vector<64x32xf32>
    %cst_7 = arith.constant dense<0.000000e+00> : vector<64x128xf32>
    %8 = tpu.matmul %7, %6, %cst_7 {dimension_numbers = #tpu.dot_dimension_numbers<[1], [0], [0], [1], [0, 0, 1, 1], [], []>} : vector<64x32xf32>, vector<32x128xf32>, vector<64x128xf32> -> vector<64x128xf32>
    %c0_8 = arith.constant 0 : index
    %c0_9 = arith.constant 0 : index
    %9 = vector.load %arg5[%c0_8, %c0_9] : memref<64x1xf32, #tpu.memory_space<vmem>>, vector<64x1xf32>
    %10 = vector.broadcast %9 : vector<64x1xf32> to vector<64x128xf32>
    %11 = arith.addf %8, %10 : vector<64x128xf32>
    %12 = math.tanh %11 : vector<64x128xf32>
    %c0_10 = arith.constant 0 : index
    %c0_11 = arith.constant 0 : index
    %13 = vector.load %arg6[%c0_10, %c0_11] : memref<32x64xf32, #tpu.memory_space<vmem>>, vector<32x64xf32>
    %cst_12 = arith.constant dense<0.000000e+00> : vector<32x128xf32>
    %14 = tpu.matmul %13, %12, %cst_12 {dimension_numbers = #tpu.dot_dimension_numbers<[1], [0], [0], [1], [0, 0, 1, 1], [], []>} : vector<32x64xf32>, vector<64x128xf32>, vector<32x128xf32> -> vector<32x128xf32>
    %c0_13 = arith.constant 0 : index
    %c0_14 = arith.constant 0 : index
    %15 = vector.load %arg7[%c0_13, %c0_14] : memref<32x1xf32, #tpu.memory_space<vmem>>, vector<32x1xf32>
    %16 = vector.broadcast %15 : vector<32x1xf32> to vector<32x128xf32>
    %17 = arith.addf %14, %16 : vector<32x128xf32>
    %18 = math.tanh %17 : vector<32x128xf32>
    %c0_15 = arith.constant 0 : index
    %c0_16 = arith.constant 0 : index
    %19 = vector.load %arg8[%c0_15, %c0_16] : memref<16x32xf32, #tpu.memory_space<vmem>>, vector<16x32xf32>
    %cst_17 = arith.constant dense<0.000000e+00> : vector<16x128xf32>
    %20 = tpu.matmul %19, %18, %cst_17 {dimension_numbers = #tpu.dot_dimension_numbers<[1], [0], [0], [1], [0, 0, 1, 1], [], []>} : vector<16x32xf32>, vector<32x128xf32>, vector<16x128xf32> -> vector<16x128xf32>
    %c0_18 = arith.constant 0 : index
    %c0_19 = arith.constant 0 : index
    %21 = vector.load %arg9[%c0_18, %c0_19] : memref<16x1xf32, #tpu.memory_space<vmem>>, vector<16x1xf32>
    %22 = vector.broadcast %21 : vector<16x1xf32> to vector<16x128xf32>
    %23 = arith.addf %20, %22 : vector<16x128xf32>
    %24 = arith.negf %23 : vector<16x128xf32>
    %25 = math.exp %24 : vector<16x128xf32>
    %cst_20 = arith.constant 1.000000e+00 : f32
    %26 = vector.broadcast %cst_20 : f32 to vector<16x128xf32>
    %27 = arith.addf %26, %25 : vector<16x128xf32>
    %28 = arith.divf %26, %27 : vector<16x128xf32>
    %c0_21 = arith.constant 0 : index
    %c0_22 = arith.constant 0 : index
    %29 = vector.load %arg10[%c0_21, %c0_22] : memref<16x128xf32, #tpu.memory_space<vmem>>, vector<16x128xf32>
    tpu.vector_store %arg10[%c0_21, %c0_22], %28 {strides = array<i32>} : memref<16x128xf32, #tpu.memory_space<vmem>>, vector<16x128xf32>,
    return
  }
  func.func @transform_0(%arg0: i32) -> (i32, i32) {
    %c0_i32 = arith.constant 0 : i32
    %c0_i32_0 = arith.constant 0 : i32
    return %c0_i32, %arg0 : i32, i32
  }
  func.func @transform_1(%arg0: i32) -> (i32, i32) {
    %c0_i32 = arith.constant 0 : i32
    %c0_i32_0 = arith.constant 0 : i32
    %c0_i32_1 = arith.constant 0 : i32
    return %c0_i32, %c0_i32_0 : i32, i32
  }
  func.func @transform_2(%arg0: i32) -> (i32, i32) {
    %c0_i32 = arith.constant 0 : i32
    %c0_i32_0 = arith.constant 0 : i32
    %c0_i32_1 = arith.constant 0 : i32
    return %c0_i32, %c0_i32_0 : i32, i32
  }
  func.func @transform_3(%arg0: i32) -> (i32, i32) {
    %c0_i32 = arith.constant 0 : i32
    %c0_i32_0 = arith.constant 0 : i32
    %c0_i32_1 = arith.constant 0 : i32
    return %c0_i32, %c0_i32_0 : i32, i32
  }
  func.func @transform_4(%arg0: i32) -> (i32, i32) {
    %c0_i32 = arith.constant 0 : i32
    %c0_i32_0 = arith.constant 0 : i32
    %c0_i32_1 = arith.constant 0 : i32
    return %c0_i32, %c0_i32_0 : i32, i32
  }
  func.func @transform_5(%arg0: i32) -> (i32, i32) {
    %c0_i32 = arith.constant 0 : i32
    %c0_i32_0 = arith.constant 0 : i32
    %c0_i32_1 = arith.constant 0 : i32
    return %c0_i32, %c0_i32_0 : i32, i32
  }
  func.func @transform_6(%arg0: i32) -> (i32, i32) {
    %c0_i32 = arith.constant 0 : i32
    %c0_i32_0 = arith.constant 0 : i32
    %c0_i32_1 = arith.constant 0 : i32
    return %c0_i32, %c0_i32_0 : i32, i32
  }
  func.func @transform_7(%arg0: i32) -> (i32, i32) {
    %c0_i32 = arith.constant 0 : i32
    %c0_i32_0 = arith.constant 0 : i32
    %c0_i32_1 = arith.constant 0 : i32
    return %c0_i32, %c0_i32_0 : i32, i32
  }
  func.func @transform_8(%arg0: i32) -> (i32, i32) {
    %c0_i32 = arith.constant 0 : i32
    %c0_i32_0 = arith.constant 0 : i32
    %c0_i32_1 = arith.constant 0 : i32
    return %c0_i32, %c0_i32_0 : i32, i32
  }
  func.func @transform_9(%arg0: i32) -> (i32, i32) {
    %c0_i32 = arith.constant 0 : i32
    %c0_i32_0 = arith.constant 0 : i32
    return %c0_i32, %arg0 : i32, i32
  }
}

</mosaic_0001>

<bundles_post_ra>
// kernel: generator3_forward.1
= control target key start
LH: loop header
LB: loop body
LE: loop exit
PB: predicated region body
PF: predicated region fallthrough
CT: control target
= control target key end

     0   :  { %s1307_s30 = smov 0   ;;  %s1309_s10 = smov 0   ;;  %s1497_s0 = inlined_call_operand.vmem [shape: f32[16,256], index: 0, kind: input, shape index: {}]   ;;  %s1498_s1 = inlined_call_operand.vmem [shape: f32[32,16], index: 1, kind: input, shape index: {}]   ;;  %s1499_s2 = inlined_call_operand.vmem [shape: f32[32,1], index: 2, kind: input, shape index: {}]   ;;  %s1500_s3 = inlined_call_operand.vmem [shape: f32[64,32], index: 3, kind: input, shape index: {}]   ;;  %s1501_s4 = inlined_call_operand.vmem [shape: f32[64,1], index: 4, kind: input, shape index: {}]   ;;  %s1502_s5 = inlined_call_operand.vmem [shape: f32[32,64], index: 5, kind: input, shape index: {}]   ;;  %s1503_s6 = inlined_call_operand.vmem [shape: f32[32,1], index: 6, kind: input, shape index: {}]   ;;  %s1504_s7 = inlined_call_operand.vmem [shape: f32[16,32], index: 7, kind: input, shape index: {}]   ;;  %s1505_s8 = inlined_call_operand.vmem [shape: f32[16,1], index: 8, kind: input, shape index: {}]   ;;  %s1506_s9 = inlined_call_operand.vmem [shape: f32[16,256], index: 9, kind: output, shape index: {}]  }
   0x1   :  { %s1311_s11 = smov 0  }
   0x2 LB: > { %s1033_s12 = sadd.s32 4294967295, %s1254_s11   ;;  %s1324_s13 = sadd.s32 1, %s1254_s11   ;;  %s1254_s11 = sphi %s1311_s11, %s1510_s11   ;;  %s1250_s10 = sphi %s1309_s10, %s1509_s10   ;;  %s1246_s30 = sphi %s1307_s30, %s1508_s30  }
   0x3   : > { %s23_s14 = ssub.s32 %s1254_s11, %s1324_s13  ;;  %s26_s15 = sadd.s32 1, %s1250_s10 }
   0x4   : > { %p24_p0 = scmp.eq.s32.totalorder %s23_s14, 0  ;;  %p33_p1 = scmp.ne.s32.totalorder %s1250_s10, %s1246_s30 }
   0x5   : > { %p34_p2 = scmp.eq.s32.totalorder %s1254_s11, 0  ;;  %p231_p3 = scmp.eq.s32.totalorder %s1033_s12, 1 }
   0x6   : > { %s1335_s16 = scalar_select %p24_p0, %s1250_s10, %s26_s15  }
   0x7   : > { %p35_p4 = por %p34_p2, %p33_p1  ;;  %p1337_p5 = por %p231_p3, %p33_p1 }
   0x8   : > { %p1036_p6 = scmp.ge.s32.totalorder %s1254_s11, 2 }
   0xa   : > { %277 = sbr.rel (%p1036_p6) target bundleno = 20 (0x14), region = 48 }
   0xf   : > { %280 = sbr.rel (!%p35_p4) target bundleno = 20 (0x14), region = 52  ;;  %s282_s18 = sand.u32 (%p35_p4), 1, %s1250_s10  }
  0x10   : > { %s1038_s19 = sshll.u32 (%p35_p4), %s1254_s11, 3  ;;  %s1037_s20 = sshll.u32 (%p35_p4), %s282_s18, 4 }
  0x11   : > { %s286_s23 = scalar_lea.vmem (%p35_p4), %s1497_s0, %s1038_s19  ;;  %s284_s24 = scalar_lea.vmem (%p35_p4), [#allocation2], %s1037_s20 }
  0x12   : > { %v317_v0 = vld [vmem:[%s286_s23] sm:$0xff] (%p35_p4)  ;;  %v319_v1 = vld [vmem:[%s286_s23 + $0x10] sm:$0xff] (%p35_p4) }
  0x13   : > { %318 = vst [vmem:[%s284_s24] sm:$0xff] (%p35_p4), %v317_v0  ;;  %320 = vst [vmem:[%s284_s24 + $0x8] sm:$0xff] (%p35_p4), %v319_v1 }
  0x14 PF: > { %p1039_p7 = scmp.ge.s32.totalorder %s1254_s11, 1  ;;  %p325_p8 = scmp.lt.s32.totalorder %s1254_s11, 3 }
  0x16   : > { %p326_p9 = pnand %p1039_p7, %p325_p8 }
  0x17   : > { %s332_s25 = sand.u32 (!%p326_p9), 1, %s1246_s30  }
  0x18   : > { %329 = sbr.rel (%p326_p9) target bundleno = 953 (0x3b9), region = 90  ;;  %s1353_s28 = sshll.u32 (!%p326_p9), %s332_s25, 4 }
  0x19   : > { %s334_s18 = scalar_lea.vmem (!%p326_p9), [#allocation2], %s1353_s28  ;;  %s365_s14 = scalar_lea.vmem (!%p326_p9), [#allocation3], %s1353_s28 }
  0x1d   : > { %v366_v2 = vld [vmem:[%s1498_s1] sm:$0xff]  ;;  %vm396_vm0 = vcmask 130048   ;;  %v1256_v3 = vmov 0   ;;  %v375_v4 = vld [vmem:[%s1499_s2 + $0x18] sm:$0xff]  ;;  %v373_v5 = vld [vmem:[%s1499_s2 + $0x8] sm:$0xff]  ;;  %vm554_vm1 = vcmask 261120  }
  0x1e   : > { %1106 = vmatprep.mubr.msk.f32.mxu0 %vm396_vm0, %v366_v2  ;;  %1190 = vset.pattern.permute.xlu0 %v1256_v3  ;;  %v371_v6 = vld [vmem:[%s334_s18 + $0x8] sm:$0xff]  ;;  %v370_v7 = vld [vmem:[%s334_s18] sm:$0xff]  ;;  %vm720_vm2 = vcmask 523264   ;;  %s1063_s15 = sshll.u32 (%p1337_p5), %s1033_s12, 3 }
  0x1f   : > { %393 = vperm.xlu0 %1190, %v375_v4   ;;  %1191 = vset.pattern.permute.xlu1 %v1256_v3  ;;  %v374_v8 = vld [vmem:[%s1499_s2 + $0x10] sm:$0xff]  ;;  %v372_v9 = vld [vmem:[%s1499_s2] sm:$0xff]  ;;  %v367_v10 = vld [vmem:[%s1498_s1 + $0x8] sm:$0xff]  ;;  %s939_s19 = scalar_lea.vmem (%p1337_p5), %s1506_s9, %s1063_s15 }
  0x20   : > { %383 = vperm.xlu1 %1191, %v373_v5   ;;  %1102 = vmatprep.subr.mxu0 %v371_v6  ;;  %v368_v11 = vld [vmem:[%s1498_s1 + $0x10] sm:$0xff]  ;;  %v513_v12 = vld [vmem:[%s1501_s4 + $0x38] sm:$0xff]  ;;  %v511_v15 = vld [vmem:[%s1501_s4 + $0x28] sm:$0xff] }
  0x21   : > { %1103 = vmatpush3.msra.mxu0 %v371_v6  ;;  %v512_v13 = vld [vmem:[%s1501_s4 + $0x30] sm:$0xff]  ;;  %v369_v14 = vld [vmem:[%s1498_s1 + $0x18] sm:$0xff]  ;;  %v510_v16 = vld [vmem:[%s1501_s4 + $0x20] sm:$0xff] }
  0x22   : > { %1104 = vmatprep.subr.mxu0 %v370_v7  ;;  %v509_v17 = vld [vmem:[%s1501_s4 + $0x18] sm:$0xff]  ;;  %v508_v18 = vld [vmem:[%s1501_s4 + $0x10] sm:$0xff]  ;;  %v507_v19 = vld [vmem:[%s1501_s4 + $0x8] sm:$0xff] }
  0x23   : > { %388 = vperm.xlu0 %1190, %v374_v8   ;;  %1105 = vmatpush3.msra.mxu0 %v370_v7  ;;  %v506_v20 = vld [vmem:[%s1501_s4] sm:$0xff]  ;;  %v699_v21 = vld [vmem:[%s1503_s6 + $0x18] sm:$0xff]  ;;  %v698_v22 = vld [vmem:[%s1503_s6 + $0x10] sm:$0xff] }
  0x24   : > { %378 = vperm.xlu1 %1191, %v372_v9   ;;  %1107 = vmatmul.mubr.msk.f32.vlgmr.msra.gmra.mxu0 %vm396_vm0, %v367_v10  ;;  %v697_v23 = vld [vmem:[%s1503_s6 + $0x8] sm:$0xff]  ;;  %v696_v24 = vld [vmem:[%s1503_s6] sm:$0xff]  ;;  %v500_v45 = vld [vmem:[%s1500_s3 + $0x10] sm:$0xff] }
  0x25   : > { %1109 = vmatprep.mubr.msk.f32.mxu0 %vm396_vm0, %v368_v11  ;;  %v824_v25 = vld [vmem:[%s1505_s8] sm:$0xff]  ;;  %v825_v26 = vld [vmem:[%s1505_s8 + $0x8] sm:$0xff]  ;;  %v501_v46 = vld [vmem:[%s1500_s3 + $0x18] sm:$0xff] }
  0x26   : > { %v498_v27 = vld [vmem:[%s1500_s3] sm:$0xff]  ;;  %v499_v44 = vld [vmem:[%s1500_s3 + $0x8] sm:$0xff]  ;;  %v504_v49 = vld [vmem:[%s1500_s3 + $0x30] sm:$0xff] }
  0x27   : > { %551 = vperm.xlu0 %1190, %v513_v12   ;;  %1120 = vmatprep.mubr.msk.f32.mxu1 %vm554_vm1, %v498_v27  ;;  %v502_v47 = vld [vmem:[%s1500_s3 + $0x20] sm:$0xff]  ;;  %v503_v48 = vld [vmem:[%s1500_s3 + $0x28] sm:$0xff]  ;;  %v505_v50 = vld [vmem:[%s1500_s3 + $0x38] sm:$0xff] }
  0x28   : > { %546 = vperm.xlu1 %1191, %v512_v13   ;;  %1110 = vmatmul.mubr.msk.f32.gmra.mxu0 %vm396_vm0, %v369_v14  ;;  %v692_v51 = vld [vmem:[%s1502_s5] sm:$0xff] }
  0x29   : > { %1148 = vmatprep.mubr.msk.f32.mxu0 %vm720_vm2, %v692_v51 }
  0x2b   : > { %541 = vperm.xlu0 %1190, %v511_v15  }
  0x2c   : > { %536 = vperm.xlu1 %1191, %v510_v16  }
  0x2f   : > { %531 = vperm.xlu0 %1190, %v509_v17  }
  0x30   : > { %526 = vperm.xlu1 %1191, %v508_v18  }
  0x33   : > { %521 = vperm.xlu0 %1190, %v507_v19  }
  0x34   : > { %516 = vperm.xlu1 %1191, %v506_v20   ;;  %v693_v20 = vld [vmem:[%s1502_s5 + $0x8] sm:$0xff] }
  0x37   : > { %717 = vperm.xlu0 %1190, %v699_v21   ;;  %v694_v21 = vld [vmem:[%s1502_s5 + $0x10] sm:$0xff] }
  0x38   : > { %712 = vperm.xlu1 %1191, %v698_v22   ;;  %v695_v22 = vld [vmem:[%s1502_s5 + $0x18] sm:$0xff] }
  0x3b   : > { %707 = vperm.xlu0 %1190, %v697_v23   ;;  %v822_v23 = vld [vmem:[%s1504_s7] sm:$0xff] }
  0x3c   : > { %702 = vperm.xlu1 %1191, %v696_v24  }
  0x3f   : > { %828 = vperm.xlu0 %1190, %v824_v25  }
  0x40   : > { %833 = vperm.xlu1 %1191, %v825_v26  }
  0x9a   : > { %v394_v28 = vpop.permute.xlu0 %393 }
  0x9b   : > { %v384_v30 = vpop.permute.xlu1 %383 }
  0x9e   : > { %v389_v34 = vpop.permute.xlu0 %388 }
  0x9f   : > { %v379_v38 = vpop.permute.xlu1 %378 }
  0xa2   : > { %v552_v54 = vpop.permute.xlu0 %551 }
  0xa3   : > { %v547_v56 = vpop.permute.xlu1 %546 }
  0xa6   : > { %v542_v59 = vpop.permute.xlu0 %541 }
  0xa7   : > { %v537_v61 = vpop.permute.xlu1 %536 }
  0xaa   : > { %v532_v3 = vpop.permute.xlu0 %531 }
  0xab   : > { %v527_v5 = vpop.permute.xlu1 %526 }
  0xae   : > { %v522_v8 = vpop.permute.xlu0 %521 }
  0xaf   : > { %v517_v10 = vpop.permute.xlu1 %516 }
  0xb2   : > { %v718_v24 = vpop.permute.xlu0 %717 }
  0xb3   : > { %v713_v26 = vpop.permute.xlu1 %712 }
  0xe4   : > { %v1108_v29 = vpop.f32.mrf.mxu0 }
  0xe5   : > { %v481_v36 = vadd.f32 %v1108_v29, %v384_v30  ;;  %v708_v30 = vpop.permute.xlu0 %707 }
  0xe6   : > { %v475_v31 = vpop.f32.mrf.mxu0 }
  0xe7   : > { %v476_v39 = vadd.f32 %v475_v31, %v379_v38 }
  0xe8   : > { %v1111_v32 = vpop.f32.mrf.mxu0 }
  0xe9   : > { %v491_v33 = vadd.f32 %v1111_v32, %v394_v28 }
  0xea   : > { %v485_v35 = vpop.f32.mrf.mxu0 }
  0xeb   : > { %1192 = vtanh.f32 %v491_v33  ;;  %v486_v37 = vadd.f32 %v485_v35, %v389_v34  ;;  %v703_v34 = vpop.permute.xlu1 %702 }
  0xed   : > { %1194 = vtanh.f32 %v486_v37 }
  0xee   : > { %1196 = vtanh.f32 %v481_v36 }
  0xef   : > { %1198 = vtanh.f32 %v476_v39 }
  0xf8   : > { %v1193_v40 = vpop.eup %1192 }
  0xf9   : > { %1112 = vmatprep.subr.mxu1 %v1193_v40 }
  0xfa   : > { %v1195_v41 = vpop.eup %1194  ;;  %1113 = vmatpush3.msra.mxu1 %v1193_v40  ;;  %v823_v40 = vld [vmem:[%s1504_s7 + $0x8] sm:$0xff] }
  0xfb   : > { %1114 = vmatprep.subr.mxu1 %v1195_v41  ;;  %v1197_v42 = vpop.eup %1196 }
  0xfc   : > { %1115 = vmatpush3.msra.mxu1 %v1195_v41  ;;  %v1199_v43 = vpop.eup %1198  ;;  %v834_v41 = vpop.permute.xlu1 %833 }
  0xfd   : > { %1116 = vmatprep.subr.mxu1 %v1197_v42 }
  0xfe   : > { %1117 = vmatpush3.msra.mxu1 %v1197_v42 }
  0xff   : > { %1118 = vmatprep.subr.mxu1 %v1199_v43 }
 0x100   : > { %1119 = vmatpush3.msra.mxu1 %v1199_v43 }
 0x101   : > { %1121 = vmatmul.mubr.msk.f32.vlgmr.msra.gmra.mxu1 %vm554_vm1, %v499_v44  ;;  %v829_v44 = vpop.permute.xlu0 %828 }
 0x102   : > { %1123 = vmatprep.mubr.msk.f32.mxu1 %vm554_vm1, %v500_v45 }
 0x105   : > { %1124 = vmatmul.mubr.msk.f32.gmra.mxu1 %vm554_vm1, %v501_v46 }
 0x106   : > { %1126 = vmatprep.mubr.msk.f32.mxu1 %vm554_vm1, %v502_v47 }
 0x109   : > { %1127 = vmatmul.mubr.msk.f32.gmra.mxu1 %vm554_vm1, %v503_v48 }
 0x10a   : > { %1129 = vmatprep.mubr.msk.f32.mxu1 %vm554_vm1, %v504_v49 }
 0x10d   : > { %1130 = vmatmul.mubr.msk.f32.gmra.mxu1 %vm554_vm1, %v505_v50 }
 0x10e   : > { %1162 = vmatprep.mubr.msk.f32.mxu1 %vm554_vm1, %v822_v23 }
 0x1c1   : > { %v1122_v52 = vpop.f32.mrf.mxu1 }
 0x1c2   : > { %v651_v9 = vadd.f32 %v1122_v52, %v522_v8 }
 0x1c3   : > { %v645_v53 = vpop.f32.mrf.mxu1 }
 0x1c4   : > { %v646_v11 = vadd.f32 %v645_v53, %v517_v10 }
 0x1c5   : > { %v1125_v55 = vpop.f32.mrf.mxu1 }
 0x1c6   : > { %v661_v6 = vadd.f32 %v1125_v55, %v532_v3 }
 0x1c7   : > { %v655_v57 = vpop.f32.mrf.mxu1 }
 0x1c8   : > { %v656_v7 = vadd.f32 %v655_v57, %v527_v5 }
 0x1c9   : > { %v1128_v58 = vpop.f32.mrf.mxu1 }
 0x1ca   : > { %v671_v1 = vadd.f32 %v1128_v58, %v542_v59 }
 0x1cb   : > { %v665_v60 = vpop.f32.mrf.mxu1 }
 0x1cc   : > { %v666_v4 = vadd.f32 %v665_v60, %v537_v61 }
 0x1cd   : > { %v1131_v62 = vpop.f32.mrf.mxu1 }
 0x1ce   : > { %v681_v63 = vadd.f32 %v1131_v62, %v552_v54 }
 0x1cf   : > { %v675_v0 = vpop.f32.mrf.mxu1 }
 0x1d0   : > { %1200 = vtanh.f32 %v681_v63  ;;  %v676_v2 = vadd.f32 %v675_v0, %v547_v56 }
 0x1d2   : > { %1202 = vtanh.f32 %v676_v2 }
 0x1d3   : > { %1204 = vtanh.f32 %v671_v1 }
 0x1d4   : > { %1206 = vtanh.f32 %v666_v4 }
 0x1d5   : > { %1208 = vtanh.f32 %v661_v6 }
 0x1d6   : > { %1210 = vtanh.f32 %v656_v7 }
 0x1d7   : > { %1212 = vtanh.f32 %v651_v9 }
 0x1d8   : > { %1214 = vtanh.f32 %v646_v11 }
 0x1dd   : > { %v1201_v12 = vpop.eup %1200 }
 0x1de   : > { %1132 = vmatprep.subr.mxu0 %v1201_v12 }
 0x1df   : > { %v1203_v13 = vpop.eup %1202  ;;  %1133 = vmatpush3.msra.mxu0 %v1201_v12 }
 0x1e0   : > { %1134 = vmatprep.subr.mxu0 %v1203_v13  ;;  %v1205_v14 = vpop.eup %1204 }
 0x1e1   : > { %1135 = vmatpush3.msra.mxu0 %v1203_v13  ;;  %v1207_v15 = vpop.eup %1206 }
 0x1e2   : > { %1136 = vmatprep.subr.mxu0 %v1205_v14  ;;  %v1209_v16 = vpop.eup %1208 }
 0x1e3   : > { %1137 = vmatpush3.msra.mxu0 %v1205_v14  ;;  %v1211_v17 = vpop.eup %1210 }
 0x1e4   : > { %1138 = vmatprep.subr.mxu0 %v1207_v15  ;;  %v1213_v18 = vpop.eup %1212 }
 0x1e5   : > { %1139 = vmatpush3.msra.mxu0 %v1207_v15  ;;  %v1215_v19 = vpop.eup %1214 }
 0x1e6   : > { %1140 = vmatprep.subr.mxu0 %v1209_v16 }
 0x1e7   : > { %1141 = vmatpush3.msra.mxu0 %v1209_v16 }
 0x1e8   : > { %1142 = vmatprep.subr.mxu0 %v1211_v17 }
 0x1e9   : > { %1143 = vmatpush3.msra.mxu0 %v1211_v17 }
 0x1ea   : > { %1144 = vmatprep.subr.mxu0 %v1213_v18 }
 0x1eb   : > { %1145 = vmatpush3.msra.mxu0 %v1213_v18 }
 0x1ec   : > { %1146 = vmatprep.subr.mxu0 %v1215_v19 }
 0x1ed   : > { %1147 = vmatpush3.msra.mxu0 %v1215_v19 }
 0x1ee   : > { %1149 = vmatmul.mubr.msk.f32.vlgmr.msra.gmra.mxu0 %vm720_vm2, %v693_v20 }
 0x1ef   : > { %1151 = vmatprep.mubr.msk.f32.mxu0 %vm720_vm2, %v694_v21 }
 0x1f2   : > { %1152 = vmatmul.mubr.msk.f32.gmra.mxu0 %vm720_vm2, %v695_v22 }
 0x2ae   : > { %v1150_v25 = vpop.f32.mrf.mxu0 }
 0x2af   : > { %v805_v32 = vadd.f32 %v1150_v25, %v708_v30 }
 0x2b0   : > { %v799_v27 = vpop.f32.mrf.mxu0 }
 0x2b1   : > { %v800_v35 = vadd.f32 %v799_v27, %v703_v34 }
 0x2b2   : > { %v1153_v28 = vpop.f32.mrf.mxu0 }
 0x2b3   : > { %v815_v29 = vadd.f32 %v1153_v28, %v718_v24 }
 0x2b4   : > { %v809_v31 = vpop.f32.mrf.mxu0 }
 0x2b5   : > { %1216 = vtanh.f32 %v815_v29  ;;  %v810_v33 = vadd.f32 %v809_v31, %v713_v26 }
 0x2b7   : > { %1218 = vtanh.f32 %v810_v33 }
 0x2b8   : > { %1220 = vtanh.f32 %v805_v32 }
 0x2b9   : > { %1222 = vtanh.f32 %v800_v35 }
 0x2c2   : > { %v1217_v36 = vpop.eup %1216 }
 0x2c3   : > { %1154 = vmatprep.subr.mxu1 %v1217_v36 }
 0x2c4   : > { %v1219_v37 = vpop.eup %1218  ;;  %1155 = vmatpush3.msra.mxu1 %v1217_v36 }
 0x2c5   : > { %1156 = vmatprep.subr.mxu1 %v1219_v37  ;;  %v1221_v38 = vpop.eup %1220 }
 0x2c6   : > { %1157 = vmatpush3.msra.mxu1 %v1219_v37  ;;  %v1223_v39 = vpop.eup %1222 }
 0x2c7   : > { %1158 = vmatprep.subr.mxu1 %v1221_v38 }
 0x2c8   : > { %1159 = vmatpush3.msra.mxu1 %v1221_v38 }
 0x2c9   : > { %1160 = vmatprep.subr.mxu1 %v1223_v39 }
 0x2ca   : > { %1161 = vmatpush3.msra.mxu1 %v1223_v39 }
 0x2cb   : > { %1163 = vmatmul.mubr.msk.f32.vlgmr.msra.gmra.mxu1 %vm554_vm1, %v823_v40 }
 0x38b   : > { %v1164_v42 = vpop.f32.mrf.mxu1 }
 0x38c   : > { %v914_v43 = vadd.f32 %v1164_v42, %v834_v41 }
 0x38d   : > { %v908_v45 = vpop.f32.mrf.mxu1 }
 0x38e   : > { %v1061_v46 = vmul.f32 -1.442695, %v914_v43  ;;  %v909_v47 = vadd.f32 %v908_v45, %v829_v44 }
 0x390   : > { %1224 = vpow2.f32 %v1061_v46  ;;  %v1060_v48 = vmul.f32 -1.442695, %v909_v47 }
 0x392   : > { %1226 = vpow2.f32 %v1060_v48 }
 0x39d   : > { %v1225_v49 = vpop.eup %1224 }
 0x39e   : > { %v924_v50 = vadd.f32 1.0, %v1225_v49 }
 0x39f   : > { %v1227_v51 = vpop.eup %1226 }
 0x3a0   : > { %1228 = vrcp.f32 %v924_v50  ;;  %v923_v52 = vadd.f32 1.0, %v1227_v51 }
 0x3a2   : > { %1230 = vrcp.f32 %v923_v52 }
 0x3ac   : > { %937 = sbr.rel (!%p1337_p5) target bundleno = 953 (0x3b9), region = 98 }
 0x3ad   : > { %v1229_v53 = vpop.eup %1228 }
 0x3ae   : > { %930 = vst [vmem:[%s365_s14 + $0x8] sm:$0xff] %v1229_v53 }
 0x3af   : > { %v1231_v54 = vpop.eup %1230 }
 0x3b0   : > { %929 = vst [vmem:[%s365_s14] sm:$0xff] %v1231_v54 }
 0x3b5   : > { %v972_v56 = vld [vmem:[%s365_s14 + $0x8] sm:$0xff] }
 0x3b6   : > { %973 = vst [vmem:[%s939_s19 + $0x10] sm:$0xff] %v972_v56 }
 0x3b7   : > { %v970_v55 = vld [vmem:[%s365_s14] sm:$0xff] }
 0x3b8   : > { %971 = vst [vmem:[%s939_s19] sm:$0xff] %v970_v55 }
 0x3b9 PF: > { %p16_p10 = scmp.ge.s32.totalorder %s1324_s13, 4   ;;  %s1508_s30 = smov %s1250_s10 }
 0x3ba   : > { %s1509_s10 = smov %s1335_s16  ;;  %s1510_s11 = smov %s1324_s13 }
 0x3bb   :  { %18 = sbr.rel (!%p16_p10) target bundleno = 2 (0x2), region = 167 }

</bundles_post_ra>
